<compile_context>
chip_gen: v7x
topology: tpu7x:2x2x1
jax: 0.10.0
libtpu: 0.0.40
codegen_flags: <defaults>
</compile_context>

<pallas_src>
import functools

import jax
import jax.numpy as jnp
from jax.experimental import pallas as pl
from jax.experimental.pallas import tpu as pltpu


def _residual_tanh_gated_rmsnorm_kernel(x_ref, x_res_ref, gate_ref, o_ref, *,
                                        eps, inv_d):
    # x_ref / x_res_ref / o_ref : (ts, Dp) tiles; gate_ref : (1, Dp) resident tile.
    x_res_f32 = x_res_ref[...].astype(jnp.float32)                        # (ts, Dp)
    # Mean over the *true* feature width: padded columns are zero so the sum is
    # unaffected; multiply by 1/true_D instead of 1/D_pad.
    mean_square = jnp.sum(x_res_f32 * x_res_f32, axis=-1, keepdims=True) * inv_d
    scale = jax.lax.rsqrt(mean_square + eps)                              # (ts, 1)
    # tanh lowers to the EUP — an idle slot here — so recomputing it per grid
    # step is free and avoids a separate XLA op + HBM round-trip.
    tanh_gate = jnp.tanh(gate_ref[...].astype(jnp.float32))               # (1, Dp)
    x_normed = (x_res_f32 * scale) * tanh_gate                            # (ts, Dp)
    o_ref[...] = x_ref[...] + x_normed.astype(o_ref.dtype)


def _vmem_policy():
    """Returns (tile_budget_bytes, vmem_limit_bytes), generation-aware."""
    try:
        cap = int(pltpu.get_tpu_info().vmem_capacity_bytes)
    except Exception:
        cap = 64 << 20  # conservative fallback (v7x per-TC worst case)
    tile_budget = (cap * 3) // 8                   # ~48 MiB v5e/v6e, ~24 MiB v7x
    vmem_limit = min(cap - (16 << 20), 100 << 20)  # headroom for Mosaic scratch
    vmem_limit = max(vmem_limit, 32 << 20)
    return tile_budget, vmem_limit


def _pick_seq_tile(B, S, D, in_dtype, out_dtype, vmem_budget_bytes, *,
                   min_total_steps=4):
    """Largest sublane-aligned sequence tile whose double-buffered working set
    fits the budget, while keeping >= ~min_total_steps grid points total (so
    the pipeline overlaps and v7x's two TensorCores both get work)."""
    in_b = jnp.dtype(in_dtype).itemsize
    out_b = jnp.dtype(out_dtype).itemsize

    # Per sequence-row VMEM cost: x + x_res inputs and out output are all
    # double-buffered by the pipeline, plus ~8 B/elt of f32 temporaries.
    per_row = D * (2 * 2 * in_b + 2 * out_b + 8)
    ts = max(1, vmem_budget_bytes // per_row)
    ts = min(ts, S)

    # Only need a handful of total grid steps; don't shrink tiles beyond that.
    steps_needed = -(-min_total_steps // max(1, B))       # ceil
    if steps_needed > 1:
        ts = min(ts, -(-S // steps_needed))               # ceil(S / steps_needed)

    # Sublane packing: 8 rows for f32, 16 for bf16, 32 for 1-byte dtypes.
    sub = max(8, 32 // max(1, min(in_b, out_b)))
    if ts >= sub:
        ts = (ts // sub) * sub        # ragged last block along S is fine
    elif S >= sub:
        ts = sub                      # at least one dense sublane group
    else:
        ts = S                        # tiny S: full-extent block is layout-legal
    return max(1, ts)


def residual_tanh_gated_rmsnorm(x, x_res, gate, eps=1e-6, *, seq_tile=None):
    """x, x_res: (B, S, D); gate: (B, D). Returns (B, S, D) with x.dtype."""
    B, S, D = x.shape
    assert x_res.shape == (B, S, D)
    assert gate.shape == (B, D)

    tile_budget, vmem_limit = _vmem_policy()

    # Lane-dense store path: pad the feature axis to a multiple of 128.
    Dp = -(-D // 128) * 128
    if Dp != D:
        pad3 = [(0, 0), (0, 0), (0, Dp - D)]
        x_k = jnp.pad(x, pad3)
        x_res_k = jnp.pad(x_res, pad3)
        gate_k = jnp.pad(gate, [(0, 0), (0, Dp - D)])
    else:
        x_k, x_res_k, gate_k = x, x_res, gate
    gate_k = gate_k.reshape(B, 1, Dp)

    if seq_tile is None:
        ts = _pick_seq_tile(B, S, Dp, x_res.dtype, x.dtype, tile_budget)
    else:
        ts = int(seq_tile)
        assert ts == S or ts % 8 == 0, "seq_tile must be a multiple of 8 or == S"
    ts = max(1, min(ts, S))

    grid = (B, pl.cdiv(S, ts))
    kernel = functools.partial(_residual_tanh_gated_rmsnorm_kernel,
                               eps=float(eps), inv_d=1.0 / D)

    in_b = jnp.dtype(x_res.dtype).itemsize
    out_b = jnp.dtype(x.dtype).itemsize
    cost = pl.CostEstimate(
        flops=5 * B * S * D,
        transcendentals=B * S + B * D,                    # rsqrt per row + tanh
        bytes_accessed=B * S * D * (2 * in_b + out_b)
                       + B * D * jnp.dtype(gate.dtype).itemsize,
    )

    out = pl.pallas_call(
        kernel,
        out_shape=jax.ShapeDtypeStruct((B, S, Dp), x.dtype),
        grid_spec=pltpu.PrefetchScalarGridSpec(
            num_scalar_prefetch=0,
            grid=grid,
            in_specs=[
                pl.BlockSpec((None, ts, Dp), lambda b, s: (b, s, 0)),  # x
                pl.BlockSpec((None, ts, Dp), lambda b, s: (b, s, 0)),  # x_res
                pl.BlockSpec((None, 1, Dp), lambda b, s: (b, 0, 0)),   # gate (resident)
            ],
            out_specs=pl.BlockSpec((None, ts, Dp), lambda b, s: (b, s, 0)),
        ),
        compiler_params=pltpu.CompilerParams(
            dimension_semantics=("parallel", "parallel"),
            vmem_limit_bytes=int(vmem_limit),
        ),
        cost_estimate=cost,
    )(x_k, x_res_k, gate_k)

    if Dp != D:
        out = out[..., :D]
    return out


def _reference(x, x_res, gate, eps=1e-6):
    x_res_f32 = x_res.astype(jnp.float32)
    mean_square = jnp.mean(x_res_f32 ** 2, axis=-1, keepdims=True)
    scale = jax.lax.rsqrt(mean_square + eps)
    tanh_gate = jnp.tanh(gate).astype(jnp.float32)[:, None, :]
    x_normed = x_res_f32 * scale * tanh_gate
    return x + x_normed.astype(x.dtype)


if __name__ == "__main__":
    key = jax.random.PRNGKey(0)

    # Test 1: small f32 shapes (non-128-multiple D exercises the padding path).
    B, S, D = 2, 8, 32
    kx, kr, kg, key = jax.random.split(key, 4)
    x = jax.random.normal(kx, (B, S, D), dtype=jnp.float32)
    x_res = jax.random.normal(kr, (B, S, D), dtype=jnp.float32)
    gate = jax.random.normal(kg, (B, D), dtype=jnp.float32)

    out = jax.block_until_ready(residual_tanh_gated_rmsnorm(x, x_res, gate))
    ref = _reference(x, x_res, gate)
    assert out.shape == ref.shape and out.dtype == ref.dtype
    assert jnp.allclose(out, ref, atol=1e-5, rtol=1e-5)

    # Test 2: bf16 with a ragged sequence tiling (S not a multiple of the tile).
    B2, S2, D2 = 1, 20, 128
    kx, kr, kg, key = jax.random.split(key, 4)
    x2 = jax.random.normal(kx, (B2, S2, D2), dtype=jnp.bfloat16)
    x_res2 = jax.random.normal(kr, (B2, S2, D2), dtype=jnp.bfloat16)
    gate2 = jax.random.normal(kg, (B2, D2), dtype=jnp.bfloat16)

    out2 = jax.block_until_ready(residual_tanh_gated_rmsnorm(x2, x_res2, gate2))
    ref2 = _reference(x2, x_res2, gate2)
    assert out2.shape == ref2.shape and out2.dtype == ref2.dtype
    assert jnp.allclose(out2.astype(jnp.float32), ref2.astype(jnp.float32),
                        atol=2e-2, rtol=2e-2)

    print("KERNEL_OK")
</pallas_src>

<mosaic_0001>
module attributes {stable_mosaic.version = 11 : i64} {
  func.func @_residual_tanh_gated_rmsnorm_kernel(%arg0: i32, %arg1: i32, %arg2: memref<1x8x128xf32, #tpu.memory_space<vmem>>, %arg3: memref<1x8x128xf32, #tpu.memory_space<vmem>>, %arg4: memref<1x1x128xf32, #tpu.memory_space<vmem>>, %arg5: memref<1x8x128xf32, #tpu.memory_space<vmem>>) attributes {dimension_semantics = [#tpu.dimension_semantics<parallel>, #tpu.dimension_semantics<parallel>], iteration_bounds = array<i64: 2, 1>, scalar_prefetch = 0 : i64, scratch_operands = 0 : i64, tpu.core_type = #tpu.core_type<tc>, window_params = [{transform_indices = @transform_0, window_bounds = array<i64: 1, 8, 128>}, {transform_indices = @transform_1, window_bounds = array<i64: 1, 8, 128>}, {transform_indices = @transform_2, window_bounds = array<i64: 1, 1, 128>}, {transform_indices = @transform_3, window_bounds = array<i64: 1, 8, 128>}]} {
    %c0 = arith.constant 0 : index
    %c0_0 = arith.constant 0 : index
    %c0_1 = arith.constant 0 : index
    %0 = vector.load %arg3[%c0, %c0_0, %c0_1] : memref<1x8x128xf32, #tpu.memory_space<vmem>>, vector<1x8x128xf32>
    %1 = vector.shape_cast %0 : vector<1x8x128xf32> to vector<8x128xf32>
    %2 = arith.mulf %1, %1 : vector<8x128xf32>
    %cst = arith.constant dense<0.000000e+00> : vector<8xf32>
    %3 = vector.multi_reduction <add>, %2, %cst [1] : vector<8x128xf32> to vector<8xf32>
    %4 = vector.shape_cast %3 : vector<8xf32> to vector<8x1xf32>
    %cst_2 = arith.constant 3.125000e-02 : f32
    %5 = vector.broadcast %cst_2 : f32 to vector<8x1xf32>
    %6 = arith.mulf %4, %5 : vector<8x1xf32>
    %cst_3 = arith.constant 9.99999997E-7 : f32
    %7 = vector.broadcast %cst_3 : f32 to vector<8x1xf32>
    %8 = arith.addf %6, %7 : vector<8x1xf32>
    %9 = math.rsqrt %8 : vector<8x1xf32>
    %c0_4 = arith.constant 0 : index
    %c0_5 = arith.constant 0 : index
    %c0_6 = arith.constant 0 : index
    %10 = vector.load %arg4[%c0_4, %c0_5, %c0_6] : memref<1x1x128xf32, #tpu.memory_space<vmem>>, vector<1x1x128xf32>
    %11 = vector.shape_cast %10 : vector<1x1x128xf32> to vector<1x128xf32>
    %12 = math.tanh %11 : vector<1x128xf32>
    %13 = vector.broadcast %9 : vector<8x1xf32> to vector<8x128xf32>
    %14 = arith.mulf %1, %13 : vector<8x128xf32>
    %15 = vector.broadcast %12 : vector<1x128xf32> to vector<8x128xf32>
    %16 = arith.mulf %14, %15 : vector<8x128xf32>
    %c0_7 = arith.constant 0 : index
    %c0_8 = arith.constant 0 : index
    %c0_9 = arith.constant 0 : index
    %17 = vector.load %arg2[%c0_7, %c0_8, %c0_9] : memref<1x8x128xf32, #tpu.memory_space<vmem>>, vector<1x8x128xf32>
    %18 = vector.shape_cast %17 : vector<1x8x128xf32> to vector<8x128xf32>
    %19 = arith.addf %18, %16 : vector<8x128xf32>
    %c0_10 = arith.constant 0 : index
    %c0_11 = arith.constant 0 : index
    %c0_12 = arith.constant 0 : index
    %20 = vector.load %arg5[%c0_10, %c0_11, %c0_12] : memref<1x8x128xf32, #tpu.memory_space<vmem>>, vector<1x8x128xf32>
    %21 = vector.shape_cast %20 : vector<1x8x128xf32> to vector<8x128xf32>
    %22 = vector.shape_cast %19 : vector<8x128xf32> to vector<1x8x128xf32>
    tpu.vector_store %arg5[%c0_10, %c0_11, %c0_12], %22 {strides = array<i32>} : memref<1x8x128xf32, #tpu.memory_space<vmem>>, vector<1x8x128xf32>,
    return
  }
  func.func @transform_0(%arg0: i32, %arg1: i32) -> (i32, i32, i32) {
    %c0_i32 = arith.constant 0 : i32
    %c0_i32_0 = arith.constant 0 : i32
    return %arg0, %arg1, %c0_i32 : i32, i32, i32
  }
  func.func @transform_1(%arg0: i32, %arg1: i32) -> (i32, i32, i32) {
    %c0_i32 = arith.constant 0 : i32
    %c0_i32_0 = arith.constant 0 : i32
    return %arg0, %arg1, %c0_i32 : i32, i32, i32
  }
  func.func @transform_2(%arg0: i32, %arg1: i32) -> (i32, i32, i32) {
    %c0_i32 = arith.constant 0 : i32
    %c0_i32_0 = arith.constant 0 : i32
    %c0_i32_1 = arith.constant 0 : i32
    return %arg0, %c0_i32, %c0_i32_0 : i32, i32, i32
  }
  func.func @transform_3(%arg0: i32, %arg1: i32) -> (i32, i32, i32) {
    %c0_i32 = arith.constant 0 : i32
    %c0_i32_0 = arith.constant 0 : i32
    return %arg0, %arg1, %c0_i32 : i32, i32, i32
  }
}

</mosaic_0001>

<bundles_post_ra>
// kernel: tpu_custom_call.1
= control target key start
LH: loop header
LB: loop body
LE: loop exit
PB: predicated region body
PF: predicated region fallthrough
CT: control target
= control target key end

     0   :  { %8 = vsyncpa [#allocation3], 0  ;;  %s893_s0 = inlined_call_operand.hbm [shape: f32[2,8,128], index: 0, kind: input, shape index: {}]   ;;  %s894_s1 = inlined_call_operand.hbm [shape: f32[2,8,128], index: 1, kind: input, shape index: {}]   ;;  %s895_s2 = inlined_call_operand.vmem [shape: f32[2,1,128], index: 2, kind: input, shape index: {}]   ;;  %s896_s3 = inlined_call_operand.hbm [shape: f32[2,8,128], index: 3, kind: output, shape index: {}]  }
   0x1   :  { %10 = vsyncpa [#allocation3 + $0x1], 0 }
   0x2   :  { %11 = vsyncpa [#allocation6], 0 }
   0x3   :  { %13 = vsyncpa [#allocation6 + $0x1], 0 }
   0x4   :  { %14 = vsyncpa [#allocation4], 0 }
   0x5   :  { %16 = vsyncpa [#allocation4 + $0x1], 0  ;;  %s663_s12 = smov 0   ;;  %s665_s13 = smov 0  }
   0x6   :  { %s667_s14 = smov 0   ;;  %s669_s15 = smov 0  }
   0x7   :  { %s671_s16 = smov 0   ;;  %s673_s17 = smov 0  }
   0x8 LB: > { %s405_s18 = sadd.s32 4294967295, %s638_s17   ;;  %s406_s19 = sadd.s32 4294967294, %s638_s17   ;;  %s638_s17 = sphi %s673_s17, %s22_s17   ;;  %s634_s16 = sphi %s671_s16, %s916_s16   ;;  %s630_s15 = sphi %s669_s15, %s915_s15   ;;  %s626_s14 = sphi %s667_s14, %s914_s14   ;;  %s622_s13 = sphi %s665_s13, %s913_s13   ;;  %s618_s12 = sphi %s663_s12, %s912_s12  }
   0x9   : > { %s34_s20 = sadd.s32 1, %s634_s16  ;;  %s43_s21 = sadd.s32 1, %s626_s14 }
   0xa   : > { %p36_p0 = scmp.ge.s32.totalorder %s34_s20, 2  ;;  %p50_p1 = scmp.ne.s32.totalorder %s626_s14, %s622_s13 }
   0xb   : > { %p51_p2 = scmp.eq.s32.totalorder %s638_s17, 0  ;;  %p56_p3 = scmp.ne.s32.totalorder %s622_s13, %s618_s12 }
   0xc   : > { %s918_s20 = smov (%p36_p0, %s34_s20), 0  ;;  %p57_p5 = scmp.eq.s32.totalorder %s405_s18, 0 }
   0xd   : > { %p704_p4 = por %p51_p2, %p50_p1  ;;  %s38_s23 = ssub.s32 %s634_s16, %s918_s20 }
   0xe   : > { %p136_p6 = scmp.eq.s32.totalorder %s405_s18, 1  ;;  %p41_p7 = scmp.eq.s32.totalorder %s38_s23, 0 }
   0xf   : > { %p710_p8 = por %p57_p5, %p56_p3  ;;  %p142_p10 = scmp.eq.s32.totalorder %s406_s19, 1 }
  0x10   : > { %p714_p9 = por %p136_p6, %p50_p1  ;;  %p438_p13 = scmp.lt.s32.totalorder %s638_s17, 2 }
  0x11   : > { %s900_s24 = scalar_select %p710_p8, 1, 0 }
  0x12   : > { %s901_s25 = scalar_select %p714_p9, 1, 0 }
  0x13   : > { %s719_s26 = scalar_select %p41_p7, %s626_s14, %s43_s21  }
  0x14   : > { %p721_p11 = por %p142_p10, %p56_p3  ;;  %s728_s28 = sand.u32 1, %s626_s14  }
  0x15   : > { %s409_s29 = sshll.u32 %s728_s28, 3  ;;  %s410_s30 = sshll.u32 %s634_s16, 7 }
  0x16   : > { %s902_s27 = scalar_select %p721_p11, 1, 0 }
  0x17   : > { %s737_s6 = scalar_lea.hbm %s893_s0, %s410_s30  ;;  %s166_s7 = scalar_lea.vmem [#allocation2], %s409_s29 }
  0x18   : > { %s174_s8 = sshll.u32 %s166_s7, 4  ;;  %p745_p0 = pnand %p438_p13, %p704_p4  ;;  %s741_s8 = int_to_ptr.vmem [resolvable:$true] %s174_s8 }
  0x19   : > { %s163_s10 = scalar_lea.sflag [#allocation3], %s728_s28  ;;  %s492_s11 = scalar_lea.hbm %s737_s6, 128 }
  0x1a   : > { %p493_p3 = scmp.ne.s32.totalorder %s737_s6, %s492_s11  ;;  %p494_p5 = pneg %p745_p0 }
  0x1b   : > { %s497_s21 = scalar_lea.hbm %s893_s0, 256  ;;  %p498_p4 = scmp.lt.u32.totalorder %s737_s6, %s893_s0 }
  0x1c   : > { %p495_p6 = pnand %p494_p5, %p493_p3  ;;  %p499_p10 = scmp.lt.u32.totalorder %s497_s21, %s492_s11 }
  0x1d   : > { %p501_p12 = scmp.lt.u32.totalorder %s492_s11, %s737_s6 }
  0x1e   : > { %p496_p7 = pneg %p495_p6  ;;  %p500_p13 = por %p499_p10, %p498_p4 }
  0x20   : > { %p502_p1 = por %p501_p12, %p500_p13 }
  0x22   : > { %p503_p2 = pnand %p502_p1, %p496_p7 }
  0x24   : > { %506 = shalt.err (!%p503_p2)
}
  0x25   : > { %s507_s4 = scalar_lea.vmem %s741_s8, 128  ;;  %s640_s5 = smov [#allocation2]  }
  0x26   : > { %p508_p3 = scmp.ne.s32.totalorder %s741_s8, %s507_s4  ;;  %s512_s7 = sshll.u32 %s640_s5, 4  ;;  %s513_s7 = int_to_ptr.vmem [resolvable:$false] %s512_s7 }
  0x27   : > { %s514_s18 = scalar_lea.vmem %s513_s7, 256  ;;  %p515_p9 = scmp.lt.s32.totalorder %s741_s8, %s513_s7 }
  0x28   : > { %p510_p6 = pnand %p508_p3, %p494_p5  ;;  %p516_p4 = scmp.lt.s32.totalorder %s514_s18, %s507_s4 }
  0x2a   : > { %p511_p11 = pneg %p510_p6  ;;  %p517_p10 = por %p516_p4, %p515_p9 }
  0x2c   : > { %p518_p12 = pnand %p517_p10, %p511_p11 }
  0x2e   : > { %521 = shalt.err (!%p518_p12)
}
  0x2f   : > { %430 = dma.hbm_to_vmem [thread:$0]  (!%p745_p0), %s737_s6, 128, %s741_s8, %s163_s10  }
  0x30   : > { %p904_p1 = scmp.lt.s32.totalorder %s638_s17, 3  ;;  %p905_p2 = scmp.ge.s32.totalorder %s638_s17, 1 }
  0x31   : > { %s790_s22 = scalar_lea.hbm %s894_s1, %s410_s30  ;;  %s185_s23 = scalar_lea.vmem [#allocation5], %s409_s29 }
  0x32   : > { %p781_p7 = pnand %p905_p2, %p904_p1  ;;  %s193_s4 = sshll.u32 %s185_s23, 4  ;;  %s194_s4 = int_to_ptr.vmem [resolvable:$true] %s193_s4 }
  0x33   : > { %s182_s6 = scalar_lea.sflag [#allocation6], %s728_s28  ;;  %s522_s8 = scalar_lea.hbm %s790_s22, 128 }
  0x34   : > { %s906_s11 = scalar_select %p781_p7, 1, 0 }
  0x35   : > { %p523_p9 = scmp.ne.s32.totalorder %s790_s22, %s522_s8  ;;  %s527_s30 = scalar_lea.hbm %s894_s1, 256 }
  0x36   : > { %p528_p3 = scmp.lt.u32.totalorder %s790_s22, %s894_s1  ;;  %p529_p6 = scmp.lt.u32.totalorder %s527_s30, %s522_s8 }
  0x37   : > { %p525_p11 = pnand %p523_p9, %p494_p5  ;;  %p531_p10 = scmp.lt.u32.totalorder %s522_s8, %s790_s22 }
  0x38   : > { %p530_p4 = por %p529_p6, %p528_p3 }
  0x39   : > { %p526_p13 = pneg %p525_p11 }
  0x3a   : > { %p532_p12 = por %p531_p10, %p530_p4 }
  0x3c   : > { %p533_p1 = pnand %p532_p12, %p526_p13 }
  0x3e   : > { %536 = shalt.err (!%p533_p1)
}
  0x3f   : > { %s537_s28 = scalar_lea.vmem %s194_s4, 128  ;;  %s641_s29 = smov [#allocation5]  }
  0x40   : > { %p538_p2 = scmp.ne.s32.totalorder %s194_s4, %s537_s28  ;;  %s542_s19 = sshll.u32 %s641_s29, 4  ;;  %s543_s19 = int_to_ptr.vmem [resolvable:$false] %s542_s19 }
  0x41   : > { %s544_s21 = scalar_lea.vmem %s543_s19, 256  ;;  %p545_p8 = scmp.lt.s32.totalorder %s194_s4, %s543_s19 }
  0x42   : > { %p540_p9 = pnand %p538_p2, %p494_p5  ;;  %p546_p7 = scmp.lt.s32.totalorder %s544_s21, %s537_s28 }
  0x44   : > { %p541_p11 = pneg %p540_p9  ;;  %p547_p3 = por %p546_p7, %p545_p8 }
  0x46   : > { %p548_p6 = pnand %p547_p3, %p541_p11 }
  0x48   : > { %551 = shalt.err (!%p548_p6)
}
  0x49   : > { %433 = dma.hbm_to_vmem [thread:$0]  (!%p745_p0), %s790_s22, 128, %s194_s4, %s182_s6  }
  0x4a   : > { %p907_p13 = scmp.ne.s32.totalorder %s906_s11, 0 }
  0x4b   : > { %s817_s23 = sand.u32 (!%p907_p13), 1, %s622_s13   ;;  %p908_p8 = scmp.ne.s32.totalorder (!%p907_p13), %s900_s24, 0 }
  0x4c   : > { %208 = sbr.rel (%p907_p13) target bundleno = 266 (0x10a), region = 32  ;;  %s820_s8 = sshll.u32 (!%p907_p13), %s817_s23, 3 }
  0x4d   : > { %s211_s10 = scalar_lea.sflag (!%p907_p13), [#allocation3], %s817_s23  ;;  %s214_s5 = scalar_lea.vmem (!%p907_p13), [#allocation2], %s820_s8 }
  0x53   : > { %605 = dma.done.wait (%p908_p8), %s211_s10, 128  }
  0x54   : > { %607 = vsyncadd (%p908_p8), %s211_s10, 4294967168  ;;  %s220_s9 = scalar_lea.sflag [#allocation6], %s817_s23  ;;  %s223_s11 = scalar_lea.vmem [#allocation5], %s820_s8 }
  0x55   : > { %609 = dma.done.wait (%p908_p8), %s220_s9, 128  }
  0x56   : > { %611 = vsyncadd (%p908_p8), %s220_s9, 4294967168  ;;  %v257_v0 = vld [vmem:[%s223_s11] sm:$0xff]  ;;  %p254_p0 = scmp.lt.s32.totalorder %s630_s15, 1  ;;  %v268_v5 = vlaneseq  ;;  %v274_v13 = vld [vmem:[%s214_s5] sm:$0xff]  ;;  %s418_s24 = sshll.u32 %s630_s15, 7 }
  0x57   : > { %v258_v1 = vmul.f32 %v257_v0, %v257_v0  ;;  %s253_s7 = scalar_lea.vmem [#allocation7], %s820_s8  ;;  %s844_s19 = scalar_lea.hbm %s896_s3, %s418_s24 }
  0x58   : > { %s255_s22 = scalar_select %p254_p0, %s630_s15, 1  ;;  %v269_v7 = vshrl.u32 %v268_v5, 7 }
  0x59   : > { %259 = vadd.xlane.f32.xlu0 %v258_v1  ;;  %s292_s18 = sshll.u32 %s253_s7, 4  ;;  %s278_s21 = scalar_lea.sflag [#allocation4], %s817_s23  ;;  %s846_s18 = int_to_ptr.vmem [resolvable:$true] %s292_s18 }
  0x5a   : > { %s256_s30 = scalar_lea.vmem %s895_s2, %s255_s22  ;;  %v270_v8 = vsub.s32 0, %v269_v7  ;;  %s552_s10 = scalar_lea.vmem %s846_s18, 128 }
  0x5b   : > { %v264_v2 = vld [vmem:[%s256_s30] sm:$0x1]  ;;  %p553_p5 = scmp.ne.s32.totalorder %s846_s18, %s552_s10  ;;  %p909_p7 = scmp.ne.s32.totalorder %s901_s25, 0 }
  0x5c   : > { %488 = vtanh.f32 %v264_v2  ;;  %s642_s15 = smov [#allocation7]  }
  0x5d   : > { %p554_p4 = pnand %p553_p5, %p909_p7  ;;  %s556_s8 = sshll.u32 %s642_s15, 4  ;;  %s557_s8 = int_to_ptr.vmem [resolvable:$false] %s556_s8 }
  0x5e   : > { %s558_s5 = scalar_lea.vmem %s557_s8, 256  ;;  %p559_p12 = scmp.lt.s32.totalorder %s846_s18, %s557_s8 }
  0x5f   : > { %p555_p10 = pneg %p554_p4  ;;  %p560_p1 = scmp.lt.s32.totalorder %s558_s5, %s552_s10 }
  0x61   : > { %p561_p2 = por %p560_p1, %p559_p12 }
  0x63   : > { %p562_p9 = pnand %p561_p2, %p555_p10 }
  0x66   : > { %v489_v9 = vpop.eup %488 }
  0x67   : > { %v271_v10 = vrot.slane %v489_v9, %v270_v8 }
  0xe6   : > { %v260_v3 = vpop.xlane.xlu0 %259 }
  0xe7   : > { %v261_v4 = vmul.f32 0.03125, %v260_v3 }
  0xe9   : > { %v262_v6 = vadd.f32 1e-06, %v261_v4 }
  0xeb   : > { %490 = vrsqrt.f32 %v262_v6 }
  0xf5   : > { %v491_v11 = vpop.eup %490 }
  0xf6   : > { %v266_v12 = vmul.f32 %v491_v11, %v257_v0 }
  0xf8   : > { %v273_v14 = vmul.f32 %v271_v10, %v266_v12 }
  0xfa   : > { %v275_v15 = vadd.f32 %v274_v13, %v273_v14 }
  0xfc   : > { %276 = vst [vmem:[%s253_s7] sm:$0xff] %v275_v15 }
  0xfd   : > { %565 = shalt.err (!%p562_p9)
}
  0xfe   : > { %s566_s23 = scalar_lea.hbm %s844_s19, 128  ;;  %s570_s22 = scalar_lea.hbm %s896_s3, 256 }
  0xff   : > { %p567_p11 = scmp.ne.s32.totalorder %s844_s19, %s566_s23  ;;  %p571_p13 = scmp.lt.u32.totalorder %s844_s19, %s896_s3 }
 0x100   : > { %p572_p8 = scmp.lt.u32.totalorder %s570_s22, %s566_s23  ;;  %p574_p5 = scmp.lt.u32.totalorder %s566_s23, %s844_s19 }
 0x101   : > { %p568_p3 = pnand %p567_p11, %p909_p7 }
 0x102   : > { %p573_p0 = por %p572_p8, %p571_p13 }
 0x103   : > { %p569_p6 = pneg %p568_p3 }
 0x104   : > { %p575_p4 = por %p574_p5, %p573_p0 }
 0x106   : > { %p576_p10 = pnand %p575_p4, %p569_p6 }
 0x108   : > { %579 = shalt.err (!%p576_p10)
}
 0x109   : > { %425 = dma.vmem_to_hbm [thread:$0]  (%p909_p7), %s846_s18, 128, %s844_s19, %s278_s21  }
 0x10a PF: > { %s304_s30 = sand.u32 1, %s618_s12   ;;  %p910_p12 = scmp.ne.s32.totalorder %s902_s27, 0 }
 0x10b   : > { %p911_p1 = scmp.ge.s32.totalorder %s638_s17, 2  ;;  %s305_s24 = scalar_lea.sflag [#allocation4], %s304_s30 }
 0x10d   : > { %p435_p2 = pnand %p911_p1, %p910_p12 }
 0x10f   : > { %613 = dma.done.wait (!%p435_p2), %s305_s24, 128  }
 0x110   : > { %615 = vsyncadd (!%p435_p2), %s305_s24, 4294967168  ;;  %s22_s17 = sadd.s32 1, %s638_s17   ;;  %s912_s12 = smov %s622_s13 }
 0x111   : > { %p19_p9 = scmp.ge.s32.totalorder %s22_s17, 4   ;;  %s913_s13 = smov %s626_s14 }
 0x112   : > { %s914_s14 = smov %s719_s26  ;;  %s915_s15 = smov %s634_s16 }
 0x113   : > { %s916_s16 = smov %s918_s20  ;;  %21 = sbr.rel (!%p19_p9) target bundleno = 8 (0x8), region = 93 }
 0x11a   :  { %310 = vsyncpa [#allocation3], 1 }
 0x11b   :  { %312 = vsyncpa [#allocation3 + $0x1], 1 }
 0x11c   :  { %313 = vsyncpa [#allocation6], 1 }
 0x11d   :  { %315 = vsyncpa [#allocation6 + $0x1], 1 }
 0x11e   :  { %316 = vsyncpa [#allocation4], 1 }
 0x11f   :  { %318 = vsyncpa [#allocation4 + $0x1], 1 }

</bundles_post_ra>
